<compile_context>
chip_gen: v7x
topology: tpu7x:2x2x1
jax: 0.10.0
libtpu: 0.0.40
codegen_flags: <defaults>
</compile_context>

<pallas_src>
import math

import jax
import jax.numpy as jnp
from jax.experimental import pallas as pl
from jax.experimental.pallas import tpu as pltpu

_LANE = 128
_TINY_BYTES = 2 * 1024 * 1024          # below this: one full-extent block
_TARGET_TILE_BYTES = 8 * 1024 * 1024   # aim for 4-8 MiB tiles
_MAX_TILE_BYTES = 16 * 1024 * 1024


def _sublane_min(dtype) -> int:
    """Native sublane tile for the dtype (sub-32-bit dtypes pack along sublanes)."""
    size = jnp.dtype(dtype).itemsize
    if size >= 4:
        return 8
    if size == 2:
        return 16
    return 32


def _vmem_budget_bytes() -> int:
    """~75% of per-core VMEM: ~48 MiB on v7x, ~96 MiB on v5e/v6e."""
    try:
        cap = pltpu.get_tpu_info().vmem_capacity_bytes
    except Exception:
        cap = 64 * 1024 * 1024         # smallest physical per-TC VMEM (v7x)
    return max(8 * 1024 * 1024, (cap * 3) // 4)


def _copy_kernel(x_ref, o_ref):
    # Whole-tile, lane-dense copy: one unmasked store per tile.
    o_ref[...] = x_ref[...]


def _materialized_copy(x2: jax.Array) -> jax.Array:
    """Bit-exact copy of a 2D array via a Pallas TPU kernel (HBM-BW bound)."""
    N, D = x2.shape
    dtype = x2.dtype
    itemsize = jnp.dtype(dtype).itemsize
    total = N * D
    total_bytes = total * itemsize
    sub = _sublane_min(dtype)
    budget = _vmem_budget_bytes()
    # 2x double-buffered input + 2x output buffers + compiler-internal headroom.
    max_tile = min(_MAX_TILE_BYTES, budget // 5)
    target_tile = min(_TARGET_TILE_BYTES, max_tile)

    if total_bytes <= _TINY_BYTES:
        # Single full-extent block; launch overhead dominates anyway.
        return pl.pallas_call(
            _copy_kernel,
            out_shape=jax.ShapeDtypeStruct((N, D), dtype),
            grid=(1, 1),
            in_specs=[pl.BlockSpec((N, D), lambda i, j: (0, 0))],
            out_specs=pl.BlockSpec((N, D), lambda i, j: (0, 0)),
            compiler_params=pltpu.CompilerParams(
                dimension_semantics=("arbitrary", "arbitrary"),
                vmem_limit_bytes=budget,
            ),
        )(x2)

    # Canonical lane-dense slab: reshape the flat buffer to (rows, lane_w)
    # with lane_w a large multiple of 128 dividing the element count.
    lane_w = 0
    for cand in (4096, 2048, 1024, 512, 256, 128):
        if total % cand == 0:
            lane_w = cand
            break

    if lane_w:
        rows = total // lane_w
        row_bytes = lane_w * itemsize
        tile_rows = max(sub, (target_tile // row_bytes) // sub * sub)
        tile_rows = min(tile_rows, rows)
        # Guarantee >= 2 blocks so "parallel" can shard across v7x's 2 TCs.
        half = max(sub, (rows // 2) // sub * sub)
        if half < rows:
            tile_rows = min(tile_rows, half)
        out = pl.pallas_call(
            _copy_kernel,
            out_shape=jax.ShapeDtypeStruct((rows, lane_w), dtype),
            grid=(pl.cdiv(rows, tile_rows),),
            in_specs=[pl.BlockSpec((tile_rows, lane_w), lambda i: (i, 0))],
            out_specs=pl.BlockSpec((tile_rows, lane_w), lambda i: (i, 0)),
            compiler_params=pltpu.CompilerParams(
                dimension_semantics=("parallel",),
                vmem_limit_bytes=budget,
            ),
        )(jnp.reshape(x2, (rows, lane_w)))
        return jnp.reshape(out, (N, D))

    # Ragged fallback (element count not a multiple of 128): tile (N, D)
    # directly with fixed 128-multiple column tiles; Pallas masks the partial
    # edge blocks. Never falls back to a VMEM-busting full-extent tile.
    tile_d = min(2048, (D // _LANE) * _LANE) if D >= _LANE else D
    row_bytes = tile_d * itemsize
    tile_n = max(sub, (target_tile // row_bytes) // sub * sub)
    if tile_n >= N:
        tile_n = N                      # full extent is always legal
    return pl.pallas_call(
        _copy_kernel,
        out_shape=jax.ShapeDtypeStruct((N, D), dtype),
        grid=(pl.cdiv(N, tile_n), pl.cdiv(D, tile_d)),
        in_specs=[pl.BlockSpec((tile_n, tile_d), lambda i, j: (i, j))],
        out_specs=pl.BlockSpec((tile_n, tile_d), lambda i, j: (i, j)),
        compiler_params=pltpu.CompilerParams(
            dimension_semantics=("parallel", "parallel"),
            vmem_limit_bytes=budget,
        ),
    )(x2)


def flatten_pallas(x: jax.Array, materialize: bool = False) -> jax.Array:
    """PyTorch Flatten.forward: x -> (N, prod(x.shape[1:])).

    materialize=False (default): metadata-only reshape — 0 HBM bytes, no
    kernel launch (fastest possible on every TPU generation).
    materialize=True: force a bit-exact copy through the Pallas kernel.
    """
    N = x.shape[0]
    D = int(math.prod(x.shape[1:])) if x.ndim > 1 else 1
    x2 = jnp.reshape(x, (N, D))
    if not materialize:
        return x2
    return _materialized_copy(x2)


if __name__ == "__main__":
    key = jax.random.PRNGKey(0)

    # Small conv-feature-map-like shape: batch=2, channels=4, 16x16 spatial.
    x_small = jax.random.normal(key, (2, 4, 16, 16), dtype=jnp.float32)
    ref_small = jnp.reshape(x_small, (x_small.shape[0], -1))

    # Exercise the Pallas copy kernel (tiny-block path).
    y_small = flatten_pallas(x_small, materialize=True)
    jax.block_until_ready(y_small)
    assert y_small.shape == ref_small.shape, (y_small.shape, ref_small.shape)
    assert y_small.dtype == ref_small.dtype, (y_small.dtype, ref_small.dtype)
    assert jnp.array_equal(y_small, ref_small), "Pallas flatten (tiny path) mismatch"

    # Preferred production path: metadata-only reshape, no kernel launch.
    y_fast = flatten_pallas(x_small)
    assert jnp.array_equal(y_fast, ref_small), "fast-path flatten mismatch"

    # A multi-MiB input exercises the lane-dense slab path (>=2-block grid).
    x_big = jax.random.normal(key, (8, 32, 64, 64), dtype=jnp.float32)
    y_big = flatten_pallas(x_big, materialize=True)
    jax.block_until_ready(y_big)
    ref_big = jnp.reshape(x_big, (x_big.shape[0], -1))
    assert jnp.array_equal(y_big, ref_big), "Pallas flatten (slab path) mismatch"

    print("KERNEL_OK")
</pallas_src>

<mosaic_0001>
module attributes {stable_mosaic.version = 11 : i64} {
  func.func @_copy_kernel(%arg0: i32, %arg1: i32, %arg2: memref<2x1024xf32, #tpu.memory_space<vmem>>, %arg3: memref<2x1024xf32, #tpu.memory_space<vmem>>) attributes {dimension_semantics = [#tpu.dimension_semantics<arbitrary>, #tpu.dimension_semantics<arbitrary>], iteration_bounds = array<i64: 1, 1>, scalar_prefetch = 0 : i64, scratch_operands = 0 : i64, tpu.core_type = #tpu.core_type<tc>, window_params = [{pipeline_mode = #tpu.pipeline_mode<synchronous>, transform_indices = @transform_0, window_bounds = array<i64: 2, 1024>}, {pipeline_mode = #tpu.pipeline_mode<synchronous>, transform_indices = @transform_1, window_bounds = array<i64: 2, 1024>}]} {
    %c0 = arith.constant 0 : index
    %c0_0 = arith.constant 0 : index
    %0 = vector.load %arg2[%c0, %c0_0] : memref<2x1024xf32, #tpu.memory_space<vmem>>, vector<2x1024xf32>
    %c0_1 = arith.constant 0 : index
    %c0_2 = arith.constant 0 : index
    %1 = vector.load %arg3[%c0_1, %c0_2] : memref<2x1024xf32, #tpu.memory_space<vmem>>, vector<2x1024xf32>
    tpu.vector_store %arg3[%c0_1, %c0_2], %0 {strides = array<i32>} : memref<2x1024xf32, #tpu.memory_space<vmem>>, vector<2x1024xf32>,
    return
  }
  func.func @transform_0(%arg0: i32, %arg1: i32) -> (i32, i32) {
    %c0_i32 = arith.constant 0 : i32
    %c0_i32_0 = arith.constant 0 : i32
    %c0_i32_1 = arith.constant 0 : i32
    return %c0_i32, %c0_i32_0 : i32, i32
  }
  func.func @transform_1(%arg0: i32, %arg1: i32) -> (i32, i32) {
    %c0_i32 = arith.constant 0 : i32
    %c0_i32_0 = arith.constant 0 : i32
    %c0_i32_1 = arith.constant 0 : i32
    return %c0_i32, %c0_i32_0 : i32, i32
  }
}

</mosaic_0001>

<bundles_post_ra>
// kernel: tpu_custom_call.1
= control target key start
LH: loop header
LB: loop body
LE: loop exit
PB: predicated region body
PF: predicated region fallthrough
CT: control target
= control target key end

     0   :  { %6 = vsyncpa [#allocation3], 0  ;;  %s126_s0 = inlined_call_operand.hbm [shape: f32[2,1024], index: 0, kind: input, shape index: {}]   ;;  %s127_s1 = inlined_call_operand.hbm [shape: f32[2,1024], index: 1, kind: output, shape index: {}]  }
   0x1   :  { %7 = vsyncpa [#allocation4], 0  ;;  %s90_s6 = smov [#allocation2]   ;;  %s42_s10 = scalar_lea.hbm %s126_s0, 256 }
   0x2   :  { %s14_s7 = sshll.u32 %s90_s6, 4  ;;  %p43_p0 = scmp.ne.s32.totalorder %s126_s0, %s42_s10  ;;  %s15_s7 = int_to_ptr.vmem [resolvable:$true] %s14_s7 }
   0x3   :  { %p46_p1 = scmp.lt.u32.totalorder %s42_s10, %s126_s0 }
   0x5   :  { %p48_p2 = pnand %p46_p1, %p43_p0 }
   0x7   :  { %51 = shalt.err (!%p48_p2)
}
   0x8   :  { %s52_s15 = scalar_lea.vmem %s15_s7, 256  ;;  %p57_p4 = scmp.lt.s32.totalorder %s15_s7, %s15_s7 }
   0x9   :  { %p53_p3 = scmp.ne.s32.totalorder %s15_s7, %s52_s15  ;;  %p58_p5 = scmp.lt.s32.totalorder %s52_s15, %s52_s15 }
   0xb   :  { %p59_p6 = por %p58_p5, %p57_p4 }
   0xd   :  { %p60_p7 = pnand %p59_p6, %p53_p3 }
   0xf   :  { %63 = shalt.err (!%p60_p7)
}
  0x10   :  { %17 = dma.hbm_to_vmem [thread:$0]  %s126_s0, 256, %s15_s7, [#allocation3]  }
  0x11   :  { %86 = dma.done.wait [#allocation3], 256  }
  0x12   :  { %87 = vsyncadd [#allocation3], 4294967040  ;;  %s91_s18 = smov [#allocation5]   ;;  %v21_v0 = vld [vmem:[#allocation2] sm:$0xff]  ;;  %v22_v1 = vld [vmem:[#allocation2 + $0x8] sm:$0xff] }
  0x13   :  { %s31_s19 = sshll.u32 %s91_s18, 4  ;;  %23 = vst [vmem:[#allocation5] sm:$0xff] %v21_v0  ;;  %24 = vst [vmem:[#allocation5 + $0x8] sm:$0xff] %v22_v1  ;;  %s32_s19 = int_to_ptr.vmem [resolvable:$true] %s31_s19 }
  0x14   :  { %s64_s20 = scalar_lea.vmem %s32_s19, 256  ;;  %p69_p9 = scmp.lt.s32.totalorder %s32_s19, %s32_s19 }
  0x15   :  { %p65_p8 = scmp.ne.s32.totalorder %s32_s19, %s64_s20  ;;  %p70_p10 = scmp.lt.s32.totalorder %s64_s20, %s64_s20 }
  0x17   :  { %p71_p11 = por %p70_p10, %p69_p9 }
  0x19   :  { %p72_p12 = pnand %p71_p11, %p65_p8 }
  0x1b   :  { %75 = shalt.err (!%p72_p12)
}
  0x1c   :  { %s76_s0 = scalar_lea.hbm %s127_s1, 256 }
  0x1d   :  { %p77_p13 = scmp.ne.s32.totalorder %s127_s1, %s76_s0  ;;  %p80_p0 = scmp.lt.u32.totalorder %s76_s0, %s127_s1 }
  0x1f   :  { %p82_p1 = pnand %p80_p0, %p77_p13 }
  0x21   :  { %85 = shalt.err (!%p82_p1)
}
  0x22   :  { %34 = dma.vmem_to_hbm [thread:$0]  %s32_s19, 256, %s127_s1, [#allocation4]  }
  0x23   :  { %88 = dma.done.wait [#allocation4], 256  }
  0x24   :  { %89 = vsyncadd [#allocation4], 4294967040 }
  0x25   :  { %38 = vsyncpa [#allocation3], 1 }
  0x26   :  { %39 = vsyncpa [#allocation4], 1 }

</bundles_post_ra>
